<compile_context>
chip_gen: v6e
topology: v6e:2x2x1
jax: 0.10.0
libtpu: 0.0.40
codegen_flags: <defaults>
</compile_context>

<pallas_src>
import jax
import jax.numpy as jnp
from jax.experimental import pallas as pl
from jax.experimental.pallas import tpu as pltpu

METADATA_C = 4        # metadata_channels (lat, lon, depth, time)
WAVEFORM_C = 16       # waveform_channels
IN_C = METADATA_C + WAVEFORM_C   # 20
HIDDEN = 32           # hidden_channels
HEADS = 4
NUM_LAYERS = 2
LEAKY_SLOPE = 0.2     # GATConv default negative_slope
BN_EPS = 1e-5
GAT_OUT = HEADS * HIDDEN          # 128
AUG = HIDDEN + 1                  # per-head slot: 32 features + 1 "ones" column
D_AUG = HEADS * AUG               # 132
HEAD_OUT = 2                      # fused (lat, lon) output

ATTN_EXP_BF16 = True  # bf16 exp/p on v6e/v7x; set False on v5e (no bf16 VPU/EUP)


# ----------------------------- Pallas kernels -------------------------------

def _encoder_prep_kernel(feat_ref, we1_ref, be1_ref, we2_ref, be2_ref,
                         w0_ref, b0_ref, att0_ref,
                         h0_ref, a0_ref):
    """Encoders + combiner for a row tile, then layer-0 prep (h0_aug, logits)."""
    f32, bf16 = jnp.float32, jnp.bfloat16
    x = jnp.dot(feat_ref[...].astype(bf16), we1_ref[...],
                preferred_element_type=f32) + be1_ref[...]
    x = jnp.maximum(x, 0.0)                                            # [meta|wave] ReLU
    x = jnp.dot(x.astype(bf16), we2_ref[...],
                preferred_element_type=f32) + be2_ref[...]
    x = jnp.maximum(x, 0.0)                                            # [T, 32]
    # augmented GAT-0 transform: per-head [32 feat | 1] slots (ones from folded bias)
    h = jnp.dot(x.astype(bf16), w0_ref[...],
                preferred_element_type=f32) + b0_ref[...]              # [T, 132]
    h_bf = h.astype(bf16)
    h0_ref[...] = h_bf
    # all-heads attention logits in one skinny matmul: cols [0,H)=dst, [H,2H)=src
    a0_ref[...] = jnp.dot(h_bf, att0_ref[...], preferred_element_type=f32)


def _gat_heads(adj_ref, h_ref, adst_ref, asrcT_ref, sc_ref, sh_ref, res, y_ref):
    """Per-head attention + aggregation for one target-row tile; writes y_ref."""
    f32, bf16 = jnp.float32, jnp.bfloat16
    mask = adj_ref[...] > 0                                            # per-tile mask
    for k in range(HEADS):                                             # static unroll
        e = adst_ref[:, k:k + 1] + asrcT_ref[k:k + 1, :]               # [T, N]
        e = jnp.where(e > 0, e, LEAKY_SLOPE * e)                       # LeakyReLU(0.2)
        e = jnp.where(mask, e, -1e30)                                  # single mask op
        e = e - jnp.max(e, axis=1, keepdims=True)
        if ATTN_EXP_BF16:
            p = jnp.exp(e.astype(bf16))                                # bf16 EUP + MXU feed
        else:
            p = jnp.exp(e).astype(bf16)
        hk = h_ref[:, k * AUG:(k + 1) * AUG]                           # [N, 33] bf16 (feat|1)
        acc = jnp.dot(p, hk, preferred_element_type=f32)               # [T, 33] (MXU)
        l = acc[:, HIDDEN:HIDDEN + 1]                                  # fused softmax denom
        r = pl.reciprocal(l, approx=True)
        r = r * (2.0 - l * r)                                          # Newton -> ~exact
        o = acc[:, :HIDDEN] * r
        # folded epilogue: (y + gat_bias) bn -> y*scale + shift, + residual, ReLU
        o = o * sc_ref[:, k * HIDDEN:(k + 1) * HIDDEN] + sh_ref[:, k * HIDDEN:(k + 1) * HIDDEN]
        if res is not None:
            o = o + res[:, k * HIDDEN:(k + 1) * HIDDEN]
        y_ref[:, k * HIDDEN:(k + 1) * HIDDEN] = jnp.maximum(o, 0.0)


def _gat0_kernel(adj_ref, h0_ref, adst_ref, asrcT_ref, sc_ref, sh_ref,
                 w1_ref, b1_ref, att1_ref,
                 y0_ref, h1_ref, a1_ref):
    """GAT layer 0 (+BN+ReLU, no residual) and layer-1 prep for a row tile."""
    f32, bf16 = jnp.float32, jnp.bfloat16
    _gat_heads(adj_ref, h0_ref, adst_ref, asrcT_ref, sc_ref, sh_ref, None, y0_ref)
    y0 = y0_ref[...].astype(bf16)                                      # read back tile
    h1 = jnp.dot(y0, w1_ref[...], preferred_element_type=f32) + b1_ref[...]
    h1_bf = h1.astype(bf16)
    h1_ref[...] = h1_bf
    a1_ref[...] = jnp.dot(h1_bf, att1_ref[...], preferred_element_type=f32)


def _gat1_kernel(adj_ref, h1_ref, adst_ref, asrcT_ref, res_ref, sc_ref, sh_ref,
                 y1_ref):
    """GAT layer 1 (+BN + residual + ReLU) for a row tile."""
    _gat_heads(adj_ref, h1_ref, adst_ref, asrcT_ref, sc_ref, sh_ref, res_ref[...], y1_ref)


def _pool_head_kernel(pool_ref, y_ref, wp1_ref, bp1_ref, wp2_ref, bp2_ref, out_ref):
    """global_mean_pool (as a [G,N] matmul) + fused lat/lon MLP heads."""
    f32, bf16 = jnp.float32, jnp.bfloat16
    g = jnp.dot(pool_ref[...], y_ref[...], preferred_element_type=f32)  # [G, 128]
    hh = jnp.dot(g.astype(bf16), wp1_ref[...], preferred_element_type=f32) + bp1_ref[...]
    hh = jnp.maximum(hh, 0.0)                                           # [G, 64]
    out_ref[...] = jnp.dot(hh.astype(bf16), wp2_ref[...],
                           preferred_element_type=f32) + bp2_ref[...]


# --------------------------- parameter setup -------------------------------

def fuse_params(m):
    """Host-side folding into the fused-kernel operand layout (weights -> bf16)."""
    f = {}
    bf16 = jnp.bfloat16
    # encoder stage 1: block-diag([wm, ww]) so concat(meta|wave) @ we1 == branch concat.
    we1 = jnp.zeros((IN_C, HIDDEN), jnp.float32)
    we1 = we1.at[:METADATA_C, :HIDDEN // 2].set(m["wm"])
    we1 = we1.at[METADATA_C:, HIDDEN // 2:].set(m["ww"])
    f["we1"] = we1.astype(bf16)
    f["be1"] = jnp.concatenate([m["bm"], m["bw"]], axis=1)
    f["we2"] = m["wc"].astype(bf16)
    f["be2"] = m["bc"]

    for i, lp in enumerate(m["gat"]):
        fin = lp["w"].shape[0]
        # augmented layout: per-head slot of width 33 = [32 GAT columns | ones col].
        w_aug = jnp.zeros((fin, D_AUG), jnp.float32)
        b_aug = jnp.zeros((1, D_AUG), jnp.float32)
        att_aug = jnp.zeros((D_AUG, 2 * HEADS), jnp.float32)
        for k in range(HEADS):
            w_aug = w_aug.at[:, k * AUG:k * AUG + HIDDEN].set(
                lp["w"][:, k * HIDDEN:(k + 1) * HIDDEN])
            b_aug = b_aug.at[0, k * AUG + HIDDEN].set(1.0)     # constant-1 column via bias
            att_aug = att_aug.at[k * AUG:k * AUG + HIDDEN, k].set(lp["att_dst"][k])
            att_aug = att_aug.at[k * AUG:k * AUG + HIDDEN, HEADS + k].set(lp["att_src"][k])
        f[f"w{i}"] = w_aug.astype(bf16)
        f[f"b{i}"] = b_aug
        f[f"att{i}"] = att_aug.astype(bf16)
        scale = lp["gamma"] / jnp.sqrt(lp["run_var"] + BN_EPS)
        f[f"sc{i}"] = scale
        # fold GAT bias + BN shift: (y + bias)*scale + (beta - mean*scale)
        f[f"sh{i}"] = lp["bias"] * scale + lp["beta"] - lp["run_mean"] * scale

    # lat/lon heads fused: one [128,64] matmul, then block-diag [64,2] -> [G,2]
    f["wp1"] = jnp.concatenate([m["wl1"], m["wo1"]], axis=1).astype(bf16)
    f["bp1"] = jnp.concatenate([m["bl1"], m["bo1"]], axis=1)
    wp2 = jnp.zeros((2 * HIDDEN, HEAD_OUT), jnp.float32)
    wp2 = wp2.at[:HIDDEN, 0].set(m["wl2"][:, 0])
    wp2 = wp2.at[HIDDEN:, 1].set(m["wo2"][:, 0])
    f["wp2"] = wp2.astype(bf16)
    f["bp2"] = jnp.concatenate([m["bl2"], m["bo2"]], axis=1)
    return f


def init_params(key):
    keys = jax.random.split(key, 40)
    it = iter(range(40))

    def nk():
        return keys[next(it)]

    def lin(fin, fout):
        w = jax.random.normal(nk(), (fin, fout), jnp.float32) / jnp.sqrt(float(fin))
        b = 0.01 * jax.random.normal(nk(), (1, fout), jnp.float32)
        return w, b

    m = {}
    m["wm"], m["bm"] = lin(METADATA_C, HIDDEN // 2)
    m["ww"], m["bw"] = lin(WAVEFORM_C, HIDDEN // 2)
    m["wc"], m["bc"] = lin(HIDDEN, HIDDEN)

    m["gat"] = []
    fin = HIDDEN
    for _ in range(NUM_LAYERS):
        lp = {}
        lp["w"] = jax.random.normal(nk(), (fin, GAT_OUT), jnp.float32) / jnp.sqrt(float(fin))
        lp["att_src"] = 0.1 * jax.random.normal(nk(), (HEADS, HIDDEN), jnp.float32)
        lp["att_dst"] = 0.1 * jax.random.normal(nk(), (HEADS, HIDDEN), jnp.float32)
        lp["bias"] = 0.01 * jax.random.normal(nk(), (1, GAT_OUT), jnp.float32)
        lp["gamma"] = 1.0 + 0.1 * jax.random.normal(nk(), (1, GAT_OUT), jnp.float32)
        lp["beta"] = 0.1 * jax.random.normal(nk(), (1, GAT_OUT), jnp.float32)
        lp["run_mean"] = jnp.zeros((1, GAT_OUT), jnp.float32)
        lp["run_var"] = jnp.ones((1, GAT_OUT), jnp.float32)
        m["gat"].append(lp)
        fin = GAT_OUT

    m["wl1"], m["bl1"] = lin(GAT_OUT, HIDDEN)
    m["wl2"], m["bl2"] = lin(HIDDEN, 1)
    m["wo1"], m["bo1"] = lin(GAT_OUT, HIDDEN)
    m["wo2"], m["bo2"] = lin(HIDDEN, 1)

    m["fused"] = fuse_params(m)
    return m


# ------------------------------ forward ------------------------------------

def _round_up(x, m):
    return ((x + m - 1) // m) * m


def _vmem_limit_bytes(n_pad, tile):
    resident = (n_pad * D_AUG * 2            # resident source-side h_aug (bf16)
                + n_pad * 2 * HEADS * 4      # attention logits
                + 2 * tile * n_pad           # int8 adjacency row block (double-buffered)
                + 6 * tile * n_pad           # f32 e + bf16 p temporaries per head
                + 4 * tile * (GAT_OUT + D_AUG) * 4)   # output tiles (double-buffered)
    return int(min(48 * 2 ** 20, max(24 * 2 ** 20, 2 * resident)))


def aftershock_gnn_forward(metadata, waveform, edge_index, batch, params, num_graphs):
    n = metadata.shape[0]
    # Row-tile size: 256 at scale (fits v7x 64 MiB VMEM with headroom), full N when small.
    tile = 256 if n > 256 else _round_up(n, 8)
    n_pad = _round_up(n, tile)
    grid = (n_pad // tile,)

    # concat(metadata | waveform) once on host; encoder stage 1 is block-diagonal.
    feat = jnp.concatenate([metadata, waveform], axis=1)               # [N, 20]
    feat = jnp.pad(feat, ((0, n_pad - n), (0, 0)))
    # Dense int8 adjacency with self-loops (GATConv add_self_loops=True):
    # adj[i, j] = 1 iff edge j -> i.  Padded rows/cols stay 0 (fully masked, unused).
    src, tgt = edge_index[0], edge_index[1]
    adj = jnp.zeros((n_pad, n_pad), jnp.int8).at[tgt, src].set(1)
    adj = adj.at[jnp.arange(n), jnp.arange(n)].set(1)
    # Normalized mean-pool matrix [G, N_pad]: pool[g, i] = 1/count_g if batch[i]==g.
    onehot = (batch[None, :] == jnp.arange(num_graphs)[:, None]).astype(jnp.float32)
    counts = jnp.maximum(onehot.sum(axis=1, keepdims=True), 1.0)
    pool_mat = jnp.pad(onehot / counts, ((0, 0), (0, n_pad - n)))

    fp = params["fused"]
    vlim = _vmem_limit_bytes(n_pad, tile)
    cp = pltpu.CompilerParams(dimension_semantics=("parallel",), vmem_limit_bytes=vlim)
    row = lambda i: (i, 0)
    const = lambda i: (0, 0)

    # ---- call A: encoders + feature_combiner + layer-0 prep -----------------
    h0, a0 = pl.pallas_call(
        _encoder_prep_kernel,
        grid=grid,
        in_specs=[pl.BlockSpec((tile, IN_C), row),
                  pl.BlockSpec((IN_C, HIDDEN), const),
                  pl.BlockSpec((1, HIDDEN), const),
                  pl.BlockSpec((HIDDEN, HIDDEN), const),
                  pl.BlockSpec((1, HIDDEN), const),
                  pl.BlockSpec((HIDDEN, D_AUG), const),
                  pl.BlockSpec((1, D_AUG), const),
                  pl.BlockSpec((D_AUG, 2 * HEADS), const)],
        out_specs=[pl.BlockSpec((tile, D_AUG), row),
                   pl.BlockSpec((tile, 2 * HEADS), row)],
        out_shape=[jax.ShapeDtypeStruct((n_pad, D_AUG), jnp.bfloat16),
                   jax.ShapeDtypeStruct((n_pad, 2 * HEADS), jnp.float32)],
        compiler_params=cp,
    )(feat, fp["we1"], fp["be1"], fp["we2"], fp["be2"], fp["w0"], fp["b0"], fp["att0"])
    adst0, asrcT0 = a0[:, :HEADS], a0[:, HEADS:].T                     # tiny host transpose

    # ---- call B: GAT layer 0 (+BN+ReLU) and layer-1 prep --------------------
    y0, h1, a1 = pl.pallas_call(
        _gat0_kernel,
        grid=grid,
        in_specs=[pl.BlockSpec((tile, n_pad), row),          # adjacency row block (int8)
                  pl.BlockSpec((n_pad, D_AUG), const),        # resident source-side h0_aug
                  pl.BlockSpec((tile, HEADS), row),           # dst logits for this tile
                  pl.BlockSpec((HEADS, n_pad), const),        # resident src logits (lane-dense)
                  pl.BlockSpec((1, GAT_OUT), const),          # BN scale
                  pl.BlockSpec((1, GAT_OUT), const),          # BN shift (+gat bias folded)
                  pl.BlockSpec((GAT_OUT, D_AUG), const),      # layer-1 augmented weights
                  pl.BlockSpec((1, D_AUG), const),
                  pl.BlockSpec((D_AUG, 2 * HEADS), const)],
        out_specs=[pl.BlockSpec((tile, GAT_OUT), row),
                   pl.BlockSpec((tile, D_AUG), row),
                   pl.BlockSpec((tile, 2 * HEADS), row)],
        out_shape=[jax.ShapeDtypeStruct((n_pad, GAT_OUT), jnp.float32),
                   jax.ShapeDtypeStruct((n_pad, D_AUG), jnp.bfloat16),
                   jax.ShapeDtypeStruct((n_pad, 2 * HEADS), jnp.float32)],
        compiler_params=cp,
    )(adj, h0, adst0, asrcT0, fp["sc0"], fp["sh0"], fp["w1"], fp["b1"], fp["att1"])
    adst1, asrcT1 = a1[:, :HEADS], a1[:, HEADS:].T

    # ---- call C: GAT layer 1 (+BN + residual + ReLU) ------------------------
    y1 = pl.pallas_call(
        _gat1_kernel,
        grid=grid,
        in_specs=[pl.BlockSpec((tile, n_pad), row),
                  pl.BlockSpec((n_pad, D_AUG), const),
                  pl.BlockSpec((tile, HEADS), row),
                  pl.BlockSpec((HEADS, n_pad), const),
                  pl.BlockSpec((tile, GAT_OUT), row),          # residual (layer-0 output)
                  pl.BlockSpec((1, GAT_OUT), const),
                  pl.BlockSpec((1, GAT_OUT), const)],
        out_specs=pl.BlockSpec((tile, GAT_OUT), row),
        out_shape=jax.ShapeDtypeStruct((n_pad, GAT_OUT), jnp.float32),
        compiler_params=cp,
    )(adj, h1, adst1, asrcT1, y0, fp["sc1"], fp["sh1"])

    # ---- call D: global_mean_pool + fused lat/lon MLP heads -----------------
    out = pl.pallas_call(
        _pool_head_kernel,
        out_shape=jax.ShapeDtypeStruct((num_graphs, HEAD_OUT), jnp.float32),
        compiler_params=pltpu.CompilerParams(vmem_limit_bytes=vlim),
    )(pool_mat, y1, fp["wp1"], fp["bp1"], fp["wp2"], fp["bp2"])
    return out[:, 0:1], out[:, 1:2]


# ------------------------------- main ---------------------------------------

if __name__ == "__main__":
    key = jax.random.PRNGKey(0)
    kmeta, kwave, kparam = jax.random.split(key, 3)

    N = 16   # nodes
    G = 2    # graphs
    metadata = jax.random.normal(kmeta, (N, METADATA_C), jnp.float32)
    waveform = jax.random.normal(kwave, (N, WAVEFORM_C), jnp.float32)
    batch = jnp.repeat(jnp.arange(G, dtype=jnp.int32), N // G)

    # Deterministic edges: bidirectional ring inside each graph.
    srcs, tgts = [], []
    per = N // G
    for g in range(G):
        for j in range(per):
            a = g * per + j
            b = g * per + (j + 1) % per
            srcs += [a, b]
            tgts += [b, a]
    edge_index = jnp.array([srcs, tgts], dtype=jnp.int32)

    params = init_params(kparam)
    lat, lon = aftershock_gnn_forward(metadata, waveform, edge_index, batch, params, G)
    jax.block_until_ready((lat, lon))
    assert lat.shape == (G, 1) and lon.shape == (G, 1)
    assert bool(jnp.all(jnp.isfinite(lat))) and bool(jnp.all(jnp.isfinite(lon)))
    print("KERNEL_OK")
</pallas_src>

<mosaic_0001>
module attributes {stable_mosaic.version = 11 : i64} {
  func.func @_encoder_prep_kernel(%arg0: i32, %arg1: memref<16x20xf32, #tpu.memory_space<vmem>>, %arg2: memref<20x32xbf16, #tpu.memory_space<vmem>>, %arg3: memref<1x32xf32, #tpu.memory_space<vmem>>, %arg4: memref<32x32xbf16, #tpu.memory_space<vmem>>, %arg5: memref<1x32xf32, #tpu.memory_space<vmem>>, %arg6: memref<32x132xbf16, #tpu.memory_space<vmem>>, %arg7: memref<1x132xf32, #tpu.memory_space<vmem>>, %arg8: memref<132x8xbf16, #tpu.memory_space<vmem>>, %arg9: memref<16x132xbf16, #tpu.memory_space<vmem>>, %arg10: memref<16x8xf32, #tpu.memory_space<vmem>>) attributes {dimension_semantics = [#tpu.dimension_semantics<parallel>], iteration_bounds = array<i64: 1>, scalar_prefetch = 0 : i64, scratch_operands = 0 : i64, tpu.core_type = #tpu.core_type<tc>, window_params = [{transform_indices = @transform_0, window_bounds = array<i64: 16, 20>}, {pipeline_mode = #tpu.pipeline_mode<synchronous>, transform_indices = @transform_1, window_bounds = array<i64: 20, 32>}, {pipeline_mode = #tpu.pipeline_mode<synchronous>, transform_indices = @transform_2, window_bounds = array<i64: 1, 32>}, {pipeline_mode = #tpu.pipeline_mode<synchronous>, transform_indices = @transform_3, window_bounds = array<i64: 32, 32>}, {pipeline_mode = #tpu.pipeline_mode<synchronous>, transform_indices = @transform_4, window_bounds = array<i64: 1, 32>}, {pipeline_mode = #tpu.pipeline_mode<synchronous>, transform_indices = @transform_5, window_bounds = array<i64: 32, 132>}, {pipeline_mode = #tpu.pipeline_mode<synchronous>, transform_indices = @transform_6, window_bounds = array<i64: 1, 132>}, {pipeline_mode = #tpu.pipeline_mode<synchronous>, transform_indices = @transform_7, window_bounds = array<i64: 132, 8>}, {transform_indices = @transform_8, window_bounds = array<i64: 16, 132>}, {transform_indices = @transform_9, window_bounds = array<i64: 16, 8>}]} {
    %c0 = arith.constant 0 : index
    %c0_0 = arith.constant 0 : index
    %0 = vector.load %arg1[%c0, %c0_0] : memref<16x20xf32, #tpu.memory_space<vmem>>, vector<16x20xf32>
    %1 = arith.truncf %0 : vector<16x20xf32> to vector<16x20xbf16>
    %c0_1 = arith.constant 0 : index
    %c0_2 = arith.constant 0 : index
    %2 = vector.load %arg2[%c0_1, %c0_2] : memref<20x32xbf16, #tpu.memory_space<vmem>>, vector<20x32xbf16>
    %cst = arith.constant dense<0.000000e+00> : vector<16x32xf32>
    %3 = tpu.matmul %1, %2, %cst {dimension_numbers = #tpu.dot_dimension_numbers<[1], [0], [0], [1], [0, 0, 1, 1], [], []>} : vector<16x20xbf16>, vector<20x32xbf16>, vector<16x32xf32> -> vector<16x32xf32>
    %c0_3 = arith.constant 0 : index
    %c0_4 = arith.constant 0 : index
    %4 = vector.load %arg3[%c0_3, %c0_4] : memref<1x32xf32, #tpu.memory_space<vmem>>, vector<1x32xf32>
    %5 = vector.broadcast %4 : vector<1x32xf32> to vector<16x32xf32>
    %6 = arith.addf %3, %5 : vector<16x32xf32>
    %cst_5 = arith.constant 0.000000e+00 : f32
    %7 = vector.broadcast %cst_5 : f32 to vector<16x32xf32>
    %8 = arith.maximumf %6, %7 : vector<16x32xf32>
    %9 = arith.truncf %8 : vector<16x32xf32> to vector<16x32xbf16>
    %c0_6 = arith.constant 0 : index
    %c0_7 = arith.constant 0 : index
    %10 = vector.load %arg4[%c0_6, %c0_7] : memref<32x32xbf16, #tpu.memory_space<vmem>>, vector<32x32xbf16>
    %cst_8 = arith.constant dense<0.000000e+00> : vector<16x32xf32>
    %11 = tpu.matmul %9, %10, %cst_8 {dimension_numbers = #tpu.dot_dimension_numbers<[1], [0], [0], [1], [0, 0, 1, 1], [], []>} : vector<16x32xbf16>, vector<32x32xbf16>, vector<16x32xf32> -> vector<16x32xf32>
    %c0_9 = arith.constant 0 : index
    %c0_10 = arith.constant 0 : index
    %12 = vector.load %arg5[%c0_9, %c0_10] : memref<1x32xf32, #tpu.memory_space<vmem>>, vector<1x32xf32>
    %13 = vector.broadcast %12 : vector<1x32xf32> to vector<16x32xf32>
    %14 = arith.addf %11, %13 : vector<16x32xf32>
    %cst_11 = arith.constant 0.000000e+00 : f32
    %15 = vector.broadcast %cst_11 : f32 to vector<16x32xf32>
    %16 = arith.maximumf %14, %15 : vector<16x32xf32>
    %17 = arith.truncf %16 : vector<16x32xf32> to vector<16x32xbf16>
    %c0_12 = arith.constant 0 : index
    %c0_13 = arith.constant 0 : index
    %18 = vector.load %arg6[%c0_12, %c0_13] : memref<32x132xbf16, #tpu.memory_space<vmem>>, vector<32x132xbf16>
    %cst_14 = arith.constant dense<0.000000e+00> : vector<16x132xf32>
    %19 = tpu.matmul %17, %18, %cst_14 {dimension_numbers = #tpu.dot_dimension_numbers<[1], [0], [0], [1], [0, 0, 1, 1], [], []>} : vector<16x32xbf16>, vector<32x132xbf16>, vector<16x132xf32> -> vector<16x132xf32>
    %c0_15 = arith.constant 0 : index
    %c0_16 = arith.constant 0 : index
    %20 = vector.load %arg7[%c0_15, %c0_16] : memref<1x132xf32, #tpu.memory_space<vmem>>, vector<1x132xf32>
    %21 = vector.broadcast %20 : vector<1x132xf32> to vector<16x132xf32>
    %22 = arith.addf %19, %21 : vector<16x132xf32>
    %23 = arith.truncf %22 : vector<16x132xf32> to vector<16x132xbf16>
    %c0_17 = arith.constant 0 : index
    %c0_18 = arith.constant 0 : index
    %24 = vector.load %arg9[%c0_17, %c0_18] : memref<16x132xbf16, #tpu.memory_space<vmem>>, vector<16x132xbf16>
    tpu.vector_store %arg9[%c0_17, %c0_18], %23 {strides = array<i32>} : memref<16x132xbf16, #tpu.memory_space<vmem>>, vector<16x132xbf16>,
    %c0_19 = arith.constant 0 : index
    %c0_20 = arith.constant 0 : index
    %25 = vector.load %arg8[%c0_19, %c0_20] : memref<132x8xbf16, #tpu.memory_space<vmem>>, vector<132x8xbf16>
    %cst_21 = arith.constant dense<0.000000e+00> : vector<16x8xf32>
    %26 = tpu.matmul %23, %25, %cst_21 {dimension_numbers = #tpu.dot_dimension_numbers<[1], [0], [0], [1], [0, 0, 1, 1], [], []>} : vector<16x132xbf16>, vector<132x8xbf16>, vector<16x8xf32> -> vector<16x8xf32>
    %c0_22 = arith.constant 0 : index
    %c0_23 = arith.constant 0 : index
    %27 = vector.load %arg10[%c0_22, %c0_23] : memref<16x8xf32, #tpu.memory_space<vmem>>, vector<16x8xf32>
    tpu.vector_store %arg10[%c0_22, %c0_23], %26 {strides = array<i32>} : memref<16x8xf32, #tpu.memory_space<vmem>>, vector<16x8xf32>,
    return
  }
  func.func @transform_0(%arg0: i32) -> (i32, i32) {
    %c0_i32 = arith.constant 0 : i32
    %c0_i32_0 = arith.constant 0 : i32
    return %arg0, %c0_i32 : i32, i32
  }
  func.func @transform_1(%arg0: i32) -> (i32, i32) {
    %c0_i32 = arith.constant 0 : i32
    %c0_i32_0 = arith.constant 0 : i32
    %c0_i32_1 = arith.constant 0 : i32
    return %c0_i32, %c0_i32_0 : i32, i32
  }
  func.func @transform_2(%arg0: i32) -> (i32, i32) {
    %c0_i32 = arith.constant 0 : i32
    %c0_i32_0 = arith.constant 0 : i32
    %c0_i32_1 = arith.constant 0 : i32
    return %c0_i32, %c0_i32_0 : i32, i32
  }
  func.func @transform_3(%arg0: i32) -> (i32, i32) {
    %c0_i32 = arith.constant 0 : i32
    %c0_i32_0 = arith.constant 0 : i32
    %c0_i32_1 = arith.constant 0 : i32
    return %c0_i32, %c0_i32_0 : i32, i32
  }
  func.func @transform_4(%arg0: i32) -> (i32, i32) {
    %c0_i32 = arith.constant 0 : i32
    %c0_i32_0 = arith.constant 0 : i32
    %c0_i32_1 = arith.constant 0 : i32
    return %c0_i32, %c0_i32_0 : i32, i32
  }
  func.func @transform_5(%arg0: i32) -> (i32, i32) {
    %c0_i32 = arith.constant 0 : i32
    %c0_i32_0 = arith.constant 0 : i32
    %c0_i32_1 = arith.constant 0 : i32
    return %c0_i32, %c0_i32_0 : i32, i32
  }
  func.func @transform_6(%arg0: i32) -> (i32, i32) {
    %c0_i32 = arith.constant 0 : i32
    %c0_i32_0 = arith.constant 0 : i32
    %c0_i32_1 = arith.constant 0 : i32
    return %c0_i32, %c0_i32_0 : i32, i32
  }
  func.func @transform_7(%arg0: i32) -> (i32, i32) {
    %c0_i32 = arith.constant 0 : i32
    %c0_i32_0 = arith.constant 0 : i32
    %c0_i32_1 = arith.constant 0 : i32
    return %c0_i32, %c0_i32_0 : i32, i32
  }
  func.func @transform_8(%arg0: i32) -> (i32, i32) {
    %c0_i32 = arith.constant 0 : i32
    %c0_i32_0 = arith.constant 0 : i32
    return %arg0, %c0_i32 : i32, i32
  }
  func.func @transform_9(%arg0: i32) -> (i32, i32) {
    %c0_i32 = arith.constant 0 : i32
    %c0_i32_0 = arith.constant 0 : i32
    return %arg0, %c0_i32 : i32, i32
  }
}

</mosaic_0001>

<bundles_post_ra>
// kernel: tpu_custom_call.1
= control target key start
LH: loop header
LB: loop body
LE: loop exit
PB: predicated region body
PF: predicated region fallthrough
CT: control target
= control target key end

     0   :  { %v512_v1 = vmov 0.0   ;;  %vm59_vm0 = vcmask 1041408   ;;  %vm513_vm1 = vmmov 0   ;;  %vm55_vm2 = vcmask 162816   ;;  %s647_s0 = inlined_call_operand.vmem [shape: f32[16,20], index: 0, kind: input, shape index: {}]   ;;  %s648_s1 = inlined_call_operand.vmem [shape: bf16[20,32], index: 1, kind: input, shape index: {}]   ;;  %s649_s2 = inlined_call_operand.vmem [shape: f32[1,32], index: 2, kind: input, shape index: {}]   ;;  %s650_s3 = inlined_call_operand.vmem [shape: bf16[32,32], index: 3, kind: input, shape index: {}]   ;;  %s651_s4 = inlined_call_operand.vmem [shape: f32[1,32], index: 4, kind: input, shape index: {}]   ;;  %s652_s5 = inlined_call_operand.vmem [shape: bf16[32,132], index: 5, kind: input, shape index: {}]   ;;  %s653_s6 = inlined_call_operand.vmem [shape: f32[1,132], index: 6, kind: input, shape index: {}]   ;;  %s654_s7 = inlined_call_operand.vmem [shape: bf16[132,8], index: 7, kind: input, shape index: {}]   ;;  %s655_s8 = inlined_call_operand.hbm [shape: bf16[16,132], index: 8, kind: output, shape index: {0}]   ;;  %s656_s9 = inlined_call_operand.vmem [shape: f32[16,8], index: 9, kind: output, shape index: {1}]  }
   0x1   :  { %v471_v0 = vld [vmem:[%s648_s1 + $0x8] ss:$0 sps:$4 sm:$0x33]   ;;  %449 = vmatprep.subr.bf16.mxu0 %v512_v1  ;;  %v472_v3 = vld [vmem:[%s648_s1] sm:$0xff]   ;;  %453 = vmatprep.mubr.msk.bf16.mxu0 %vm513_vm1, %v512_v1 }
   0x2   :  { %v61_v2 = vsel %vm59_vm0, %v471_v0, 0  ;;  %v33_v4 = vld [vmem:[%s647_s0] sm:$0xff]  ;;  %v34_v5 = vld [vmem:[%s647_s0 + $0x8] sm:$0xff] }
   0x3   :  { %450 = vmatpush3.bf16.msra.mxu0 %v61_v2  ;;  %v35_v6 = vpack.c.bf16 %v34_v5, %v33_v4 }
   0x4   :  { %451 = vmatprep.subr.bf16.mxu0 %v512_v1 }
   0x7   :  { %452 = vmatpush3.bf16.msra.mxu0 %v472_v3 }
   0x8   :  { %457 = vmatprep.subr.bf16.mxu0 %v512_v1 }
   0xa   :  { %454 = vmatmul.mubr.msk.bf16.vlgmr.msra.gmra.mxu0 %vm55_vm2, %v35_v6 }
   0xb   :  { %461 = vmatprep.mubr.msk.bf16.mxu0 %vm513_vm1, %v512_v1 }
   0xc   :  { %15 = vsyncpa [#allocation3], 0  ;;  %v473_v7 = vld [vmem:[%s650_s3 + $0x8] sm:$0xff]   ;;  %v474_v8 = vld [vmem:[%s650_s3] sm:$0xff]   ;;  %vm130_vm3 = vcmask 261120   ;;  %v514_v23 = vmov 0   ;;  %v184_v44 = vlaneseq }
   0xd   :  { %458 = vmatpush3.bf16.msra.mxu0 %v473_v7  ;;  %v416_v9 = vld [vmem:[%s649_s2] ss:$0 sm:$0xff]  ;;  %v477_v19 = vld [vmem:[%s652_s5 + $0x14] ss:$8 sps:$4 sm:$0xff]   ;;  %v475_v20 = vld [vmem:[%s652_s5 + $0x10] ss:$8 sps:$4 sm:$0xff]   ;;  %352 = vmatprep.subr.bf16.mxu1 %v514_v23 }
   0xe   :  { %459 = vmatprep.subr.bf16.mxu0 %v512_v1  ;;  %v480_v21 = vld [vmem:[%s652_s5 + $0x4] ss:$8 sps:$4 sm:$0xff]   ;;  %v478_v22 = vld [vmem:[%s652_s5] ss:$8 sps:$4 sm:$0xff]   ;;  %v481_v24 = vld [vmem:[%s654_s7 + $0x38] sm:$0xff]   ;;  %v185_v45 = vshrl.u32 %v184_v44, 7 }
   0xf   :  { %353 = vmatpush1.bf16.msra.mxu1 %v481_v24  ;;  %v482_v25 = vld [vmem:[%s654_s7 + $0x30] sm:$0xff]   ;;  %v483_v26 = vld [vmem:[%s654_s7 + $0x28] sm:$0xff]   ;;  %v484_v27 = vld [vmem:[%s654_s7 + $0x20] sm:$0xff]   ;;  %vm272_vm4 = vcmask 1043456   ;;  %vm273_vm5 = vcmask 31748   ;;  %vm345_vm7 = vcmask 31744  }
  0x10   :  { %354 = vmatprep.subr.bf16.mxu1 %v514_v23  ;;  %v485_v28 = vld [vmem:[%s654_s7 + $0x18] sm:$0xff]   ;;  %v486_v29 = vld [vmem:[%s654_s7 + $0x10] sm:$0xff]   ;;  %v420_v30 = vld [vmem:[%s651_s4] ss:$0 sm:$0xff]  ;;  %v186_v46 = vsub.s32 0, %v185_v45  ;;  %v190_v47 = vsub.s32 1, %v185_v45 }
  0x11   :  { %460 = vmatpush3.bf16.msra.mxu0 %v474_v8  ;;  %v487_v40 = vld [vmem:[%s654_s7 + $0x8] sm:$0xff]   ;;  %v488_v41 = vld [vmem:[%s654_s7] sm:$0xff]   ;;  %vm274_vm6 = vmor %vm273_vm5, %vm272_vm4 }
  0x12   :  { %229 = vmatprep.subr.bf16.mxu0 %v477_v19  ;;  %v489_v42 = vld [vmem:[%s654_s7 + $0x40] ss:$0 sps:$4 sm:$0x33]  }
  0x13   :  { %355 = vmatpush1.bf16.msra.mxu1 %v482_v25  ;;  %v350_v43 = vsel %vm59_vm0, %v489_v42, 0  ;;  %v182_v48 = vld [vmem:[%s653_s6] sm:$0x3]  ;;  %s515_s6 = smov [#allocation2]  }
  0x14   :  { %356 = vmatprep.subr.bf16.mxu1 %v514_v23  ;;  %v187_v49 = vrot.slane %v182_v48, %v186_v46  ;;  %v191_v50 = vrot.slane %v182_v48, %v190_v47  ;;  %s401_s7 = sshll.u32 %s515_s6, 4  ;;  %s402_s7 = int_to_ptr.vmem [resolvable:$true] %s401_s7 }
  0x15   :  { %s490_s23 = scalar_lea.vmem %s402_s7, 256  ;;  %p495_p1 = scmp.lt.s32.totalorder %s402_s7, %s402_s7 }
  0x16   :  { %p491_p0 = scmp.ne.s32.totalorder %s402_s7, %s490_s23  ;;  %p496_p2 = scmp.lt.s32.totalorder %s490_s23, %s490_s23 }
  0x17   :  { %357 = vmatpush1.bf16.msra.mxu1 %v483_v26 }
  0x18   :  { %358 = vmatprep.subr.bf16.mxu1 %v514_v23  ;;  %p497_p3 = por %p496_p2, %p495_p1 }
  0x1a   :  { %p498_p4 = pnand %p497_p3, %p491_p0 }
  0x1b   :  { %359 = vmatpush1.bf16.msra.mxu1 %v484_v27 }
  0x1c   :  { %360 = vmatprep.subr.bf16.mxu1 %v514_v23 }
  0x1f   :  { %361 = vmatpush1.bf16.msra.mxu1 %v485_v28 }
  0x20   :  { %362 = vmatprep.subr.bf16.mxu1 %v514_v23 }
  0x23   :  { %363 = vmatpush1.bf16.msra.mxu1 %v486_v29 }
  0x24   :  { %364 = vmatprep.subr.bf16.mxu1 %v514_v23 }
  0x27   :  { %365 = vmatpush1.bf16.msra.mxu1 %v487_v40 }
  0x28   :  { %366 = vmatprep.subr.bf16.mxu1 %v514_v23 }
  0x2b   :  { %367 = vmatpush1.bf16.msra.mxu1 %v488_v41 }
  0x2c   :  { %382 = vmatprep.subr.bf16.mxu1 %v514_v23 }
  0x2f   :  { %383 = vmatpush2.bf16.msra.mxu1 %v350_v43 }
  0xca   :  { %v97_v10 = vpop.f32.mrf.mxu0 }
  0xcb   :  { %v98_v12 = vadd.f32 %v416_v9, %v97_v10 }
  0xcc   :  { %v455_v11 = vpop.f32.mrf.mxu0 }
  0xcd   :  { %v104_v16 = vmax.f32 %v98_v12, 0.0 }
  0xce   :  { %v100_v13 = vpop.f32.mrf.mxu0 }
  0xcf   :  { %v101_v14 = vadd.f32 %v416_v9, %v100_v13 }
  0xd0   :  { %v456_v15 = vpop.f32.mrf.mxu0 }
  0xd1   :  { %v105_v17 = vmax.f32 %v101_v14, 0.0 }
  0xd3   :  { %v106_v18 = vpack.c.bf16 %v105_v17, %v104_v16 }
  0xd5   :  { %462 = vmatmul.mubr.msk.bf16.vlgmr.msra.gmra.mxu0 %vm130_vm3, %v106_v18 }
  0xd6   :  { %230 = vmatpush1.bf16.msra.mxu0 %v475_v20  ;;  %249 = vmatprep.mubr.bf16.mxu0 %v514_v23 }
  0xd7   :  { %231 = vmatprep.subr.bf16.mxu0 %v480_v21 }
  0xda   :  { %232 = vmatpush1.bf16.msra.mxu0 %v478_v22 }
 0x195   :  { %v168_v31 = vpop.f32.mrf.mxu0 }
 0x196   :  { %v169_v33 = vadd.f32 %v420_v30, %v168_v31 }
 0x197   :  { %v463_v32 = vpop.f32.mrf.mxu0 }
 0x198   :  { %v175_v37 = vmax.f32 %v169_v33, 0.0 }
 0x199   :  { %v171_v34 = vpop.f32.mrf.mxu0 }
 0x19a   :  { %v172_v35 = vadd.f32 %v420_v30, %v171_v34 }
 0x19b   :  { %v464_v36 = vpop.f32.mrf.mxu0 }
 0x19c   :  { %v176_v38 = vmax.f32 %v172_v35, 0.0 }
 0x19e   :  { %v177_v39 = vpack.c.bf16 %v176_v38, %v175_v37 }
 0x1a0   :  { %428 = vmatmul.mubr.msk.bf16.vlgmr.msra.gmra.mxu0 %vm130_vm3, %v177_v39 }
 0x260   :  { %v251_v51 = vpop.f32.mrf.mxu0 }
 0x261   :  { %v252_v53 = vadd.f32 %v251_v51, %v187_v49 }
 0x262   :  { %v253_v52 = vpop.f32.mrf.mxu0 }
 0x263   :  { %v254_v54 = vadd.f32 %v253_v52, %v191_v50 }
 0x264   :  { %v255_v55 = vpop.f32.mrf.mxu0 }
 0x265   :  { %v441_v56 = vpack.c.bf16 %v254_v54, %v252_v53  ;;  %v256_v57 = vadd.f32 %v255_v55, %v187_v49 }
 0x266   :  { %v257_v58 = vpop.f32.mrf.mxu0 }
 0x267   :  { %275 = vst.msk [vmem:[#allocation2] sm:$0xff] %vm274_vm6, %v441_v56  ;;  %v258_v59 = vadd.f32 %v257_v58, %v191_v50  ;;  %v260_v62 = vpack.c.bf16 %v256_v57, %v252_v53 }
 0x269   :  { %v442_v60 = vpack.c.bf16 %v258_v59, %v256_v57  ;;  %v261_v61 = vpack.c.bf16 %v258_v59, %v254_v54 }
 0x26b   :  { %276 = vst.msk [vmem:[#allocation2 + $0x8] sm:$0xff] %vm274_vm6, %v442_v60  ;;  %440 = vmatprep.mubr.msk.bf16.mxu1 %vm345_vm7, %v261_v61 }
 0x26c   :  { %385 = vmatmul.mubr.bf16.vlgmr.msra.gmra.mxu1 %v260_v62 }
 0x26d   :  { %501 = shalt.err (!%p498_p4)
}
 0x26e   :  { %s516_s2 = smov 128   ;;  %s517_s24 = smov 8   ;;  %vm393_vm8 = vcmask 64512  }
 0x26f   :  { %407 = dma.vmem_to_hbm [thread:$0]  %s402_s7, 256, %s655_s8, [#allocation3], %s516_s2, %s516_s2, %s517_s24  }
 0x32c   :  { %v386_v63 = vpop.f32.mrf.mxu1 }
 0x32d   :  { %394 = vst.msk [vmem:[%s656_s9] sm:$0xff] %vm393_vm8, %v386_v63 }
 0x32e   :  { %v388_v0 = vpop.f32.mrf.mxu1 }
 0x330   :  { %v389_v1 = vpop.f32.mrf.mxu1 }
 0x331   :  { %395 = vst.msk [vmem:[%s656_s9 + $0x8] sm:$0xff] %vm393_vm8, %v389_v1 }
 0x332   :  { %v391_v2 = vpop.f32.mrf.mxu1 }
 0x333   :  { %510 = dma.done.wait [#allocation3], 256  }
 0x334   :  { %511 = vsyncadd [#allocation3], 4294967040 }
 0x335   :  { %415 = vsyncpa [#allocation3], 1 }

</bundles_post_ra>
